<compile_context>
chip_gen: v7x
topology: tpu7x:2x2x1
jax: 0.10.0
libtpu: 0.0.40
codegen_flags: <defaults>
</compile_context>

<pallas_src>
import functools

import jax
import jax.numpy as jnp
import numpy as np
from jax.experimental import pallas as pl
from jax.experimental.pallas import tpu as pltpu


def _gather_rows_kernel(idx_ref, bound_ref, table_hbm, out_ref, buf, sems,
                        *, tile_n):
    """DMA-gather `tile_n` rows of the HBM table selected by SMEM indices.

    Rows whose global position is >= bound_ref[0] are negated on store.
    """
    i = pl.program_id(0)
    base = i * tile_n

    # Issue all row DMAs (HBM -> VMEM), then wait, so the transfers overlap.
    copies = []
    for r in range(tile_n):
        row = idx_ref[base + r]                      # dynamic SMEM scalar read
        cp = pltpu.make_async_copy(
            table_hbm.at[pl.ds(row, 1), :],          # (1, D) row in HBM
            buf.at[pl.ds(r, 1), :],                  # (1, D) slot in VMEM
            sems.at[r])
        cp.start()
        copies.append(cp)
    for cp in copies:
        cp.wait()

    # Fold the (optional) negation into the single store pass.
    boundary = bound_ref[0]
    row_ids = base + jax.lax.broadcasted_iota(jnp.int32, (tile_n, 1), 0)
    sign = jnp.where(row_ids < boundary, 1.0, -1.0).astype(out_ref.dtype)
    out_ref[...] = buf[...] * sign


def _pick_tile_n(n, cap=64):
    """Rows per grid step: round up to 8, cap the number of in-flight DMAs."""
    n8 = ((n + 7) // 8) * 8
    return min(n8, cap)


def _gather_rows(indices_flat, table, boundary):
    """Gather table[indices_flat[i]] for each i; rows i >= boundary negated."""
    n = int(indices_flat.shape[0])
    tile_n = _pick_tile_n(n)
    n_pad = ((n + tile_n - 1) // tile_n) * tile_n
    idx = jnp.pad(indices_flat.astype(jnp.int32), (0, n_pad - n))  # pad -> row 0
    vocab, dim = table.shape
    grid = (n_pad // tile_n,)

    out = pl.pallas_call(
        functools.partial(_gather_rows_kernel, tile_n=tile_n),
        out_shape=jax.ShapeDtypeStruct((n_pad, dim), table.dtype),
        grid_spec=pltpu.PrefetchScalarGridSpec(
            num_scalar_prefetch=2,                       # (indices, boundary) -> SMEM
            grid=grid,
            in_specs=[pl.BlockSpec(memory_space=pl.ANY)],  # table stays in HBM
            out_specs=pl.BlockSpec((tile_n, dim),
                                   lambda i, idx_r, bnd_r: (i, 0)),
            scratch_shapes=[pltpu.VMEM((tile_n, dim), table.dtype),
                            pltpu.SemaphoreType.DMA((tile_n,))]),
        compiler_params=pltpu.CompilerParams(
            dimension_semantics=("arbitrary",)),
    )(idx, jnp.array([boundary], dtype=jnp.int32), table)

    return out[:n]


def word2vec_forward(pos_u, pos_v, neg_v, u_weight, v_weight):
    """Matches Word2Vec.forward exactly."""
    dim = u_weight.shape[1]

    # u lookup: all rows keep sign +1 (boundary past the end).
    u_flat = pos_u.reshape(-1)
    emb_u = _gather_rows(u_flat, u_weight, boundary=u_flat.shape[0])
    emb_u = emb_u.reshape(pos_u.shape + (dim,))

    # Fused v lookup: pos_v rows (+1) followed by neg_v rows (-1) in one call.
    v_flat = pos_v.reshape(-1)
    n_flat = neg_v.reshape(-1)
    n_pos = int(v_flat.shape[0])
    fused = _gather_rows(jnp.concatenate([v_flat, n_flat]), v_weight,
                         boundary=n_pos)
    emb_v = fused[:n_pos].reshape(pos_v.shape + (dim,))
    neg_emb_v = fused[n_pos:].reshape(neg_v.shape + (dim,))
    return emb_u, emb_v, neg_emb_v


def init_word2vec_params(key, vocab_size, embedding_dim):
    """Deterministic init mirroring Word2Vec.init_params()."""
    initrange = 1.0 / embedding_dim
    u_weight = jax.random.uniform(
        key, (vocab_size, embedding_dim),
        minval=-initrange, maxval=initrange, dtype=jnp.float32)
    v_weight = jnp.zeros((vocab_size, embedding_dim), dtype=jnp.float32)
    return u_weight, v_weight


if __name__ == "__main__":
    VOCAB = 256
    DIM = 128          # embedding dim on the 128-lane axis
    BATCH = 8
    NEG_K = 4

    key = jax.random.PRNGKey(0)
    k_w, k_u, k_v, k_n = jax.random.split(key, 4)

    u_weight, v_weight = init_word2vec_params(k_w, VOCAB, DIM)
    # make v_weight non-trivial so the correctness check is meaningful
    # (init_params sets it to zeros, matching the PyTorch module)
    v_weight_test = jax.random.normal(k_w, (VOCAB, DIM), dtype=jnp.float32)

    pos_u = jax.random.randint(k_u, (BATCH,), 0, VOCAB, dtype=jnp.int32)
    pos_v = jax.random.randint(k_v, (BATCH,), 0, VOCAB, dtype=jnp.int32)
    neg_v = jax.random.randint(k_n, (BATCH, NEG_K), 0, VOCAB, dtype=jnp.int32)

    emb_u, emb_v, neg_emb_v = word2vec_forward(
        pos_u, pos_v, neg_v, u_weight, v_weight_test)
    jax.block_until_ready((emb_u, emb_v, neg_emb_v))

    # sanity check against plain-JAX reference (torch embedding == row gather)
    ref_u = jnp.take(u_weight, pos_u, axis=0)
    ref_v = jnp.take(v_weight_test, pos_v, axis=0)
    ref_n = -jnp.take(v_weight_test, neg_v.reshape(-1), axis=0).reshape(
        BATCH, NEG_K, DIM)
    assert emb_u.shape == (BATCH, DIM)
    assert emb_v.shape == (BATCH, DIM)
    assert neg_emb_v.shape == (BATCH, NEG_K, DIM)
    np.testing.assert_allclose(np.asarray(emb_u), np.asarray(ref_u),
                               rtol=1e-6, atol=1e-6)
    np.testing.assert_allclose(np.asarray(emb_v), np.asarray(ref_v),
                               rtol=1e-6, atol=1e-6)
    np.testing.assert_allclose(np.asarray(neg_emb_v), np.asarray(ref_n),
                               rtol=1e-6, atol=1e-6)

    print("KERNEL_OK")
</pallas_src>

<mosaic_0001>
module attributes {stable_mosaic.version = 11 : i64} {
  func.func @_gather_rows_kernel(%arg0: i32, %arg1: memref<8xi32, #tpu.memory_space<smem>>, %arg2: memref<1xi32, #tpu.memory_space<smem>>, %arg3: memref<256x128xf32, #tpu.memory_space<any>>, %arg4: memref<8x128xf32, #tpu.memory_space<vmem>>, %arg5: memref<8x128xf32, #tpu.memory_space<vmem>>, %arg6: memref<8x!tpu.dma_semaphore, #tpu.memory_space<semaphore_mem>>) attributes {dimension_semantics = [#tpu.dimension_semantics<arbitrary>], iteration_bounds = array<i64: 1>, scalar_prefetch = 2 : i64, scratch_operands = 2 : i64, tpu.core_type = #tpu.core_type<tc>, window_params = [{}, {transform_indices = @transform_1, window_bounds = array<i64: 8, 128>}]} {
    %c8_i32 = arith.constant 8 : i32
    %0 = arith.muli %arg0, %c8_i32 : i32
    %c0_i32 = arith.constant 0 : i32
    %1 = arith.addi %0, %c0_i32 : i32
    %2 = arith.index_cast %1 : i32 to index
    %3 = memref.load %arg1[%2] : memref<8xi32, #tpu.memory_space<smem>>
    %c0_i32_0 = arith.constant 0 : i32
    %c0_i32_1 = arith.constant 0 : i32
    %4 = tpu.memref_slice %arg3[%3, %c0_i32_1] : memref<256x128xf32, #tpu.memory_space<any>> -> memref<1x128xf32, #tpu.memory_space<any>>
    %c0_i32_2 = arith.constant 0 : i32
    %c0_i32_3 = arith.constant 0 : i32
    %5 = tpu.memref_slice %arg5[%c0_i32_2, %c0_i32_3] : memref<8x128xf32, #tpu.memory_space<vmem>> -> memref<1x128xf32, #tpu.memory_space<vmem>>
    %6 = tpu.memref_slice %arg6[%c0_i32_0] : memref<8x!tpu.dma_semaphore, #tpu.memory_space<semaphore_mem>> -> memref<1x!tpu.dma_semaphore, #tpu.memory_space<semaphore_mem>>
    %7 = tpu.memref_squeeze %6 : memref<1x!tpu.dma_semaphore, #tpu.memory_space<semaphore_mem>> -> memref<!tpu.dma_semaphore, #tpu.memory_space<semaphore_mem>>
    tpu.enqueue_dma source(%4 : memref<1x128xf32, #tpu.memory_space<any>>) target(%5 : memref<1x128xf32, #tpu.memory_space<vmem>>) target_semaphore(%7 : memref<!tpu.dma_semaphore, #tpu.memory_space<semaphore_mem>>)
    %c1_i32 = arith.constant 1 : i32
    %8 = arith.addi %0, %c1_i32 : i32
    %9 = arith.index_cast %8 : i32 to index
    %10 = memref.load %arg1[%9] : memref<8xi32, #tpu.memory_space<smem>>
    %c1_i32_4 = arith.constant 1 : i32
    %c0_i32_5 = arith.constant 0 : i32
    %11 = tpu.memref_slice %arg3[%10, %c0_i32_5] : memref<256x128xf32, #tpu.memory_space<any>> -> memref<1x128xf32, #tpu.memory_space<any>>
    %c1_i32_6 = arith.constant 1 : i32
    %c0_i32_7 = arith.constant 0 : i32
    %12 = tpu.memref_slice %arg5[%c1_i32_6, %c0_i32_7] : memref<8x128xf32, #tpu.memory_space<vmem>> -> memref<1x128xf32, #tpu.memory_space<vmem>>
    %13 = tpu.memref_slice %arg6[%c1_i32_4] : memref<8x!tpu.dma_semaphore, #tpu.memory_space<semaphore_mem>> -> memref<1x!tpu.dma_semaphore, #tpu.memory_space<semaphore_mem>>
    %14 = tpu.memref_squeeze %13 : memref<1x!tpu.dma_semaphore, #tpu.memory_space<semaphore_mem>> -> memref<!tpu.dma_semaphore, #tpu.memory_space<semaphore_mem>>
    tpu.enqueue_dma source(%11 : memref<1x128xf32, #tpu.memory_space<any>>) target(%12 : memref<1x128xf32, #tpu.memory_space<vmem>>) target_semaphore(%14 : memref<!tpu.dma_semaphore, #tpu.memory_space<semaphore_mem>>)
    %c2_i32 = arith.constant 2 : i32
    %15 = arith.addi %0, %c2_i32 : i32
    %16 = arith.index_cast %15 : i32 to index
    %17 = memref.load %arg1[%16] : memref<8xi32, #tpu.memory_space<smem>>
    %c2_i32_8 = arith.constant 2 : i32
    %c0_i32_9 = arith.constant 0 : i32
    %18 = tpu.memref_slice %arg3[%17, %c0_i32_9] : memref<256x128xf32, #tpu.memory_space<any>> -> memref<1x128xf32, #tpu.memory_space<any>>
    %c2_i32_10 = arith.constant 2 : i32
    %c0_i32_11 = arith.constant 0 : i32
    %19 = tpu.memref_slice %arg5[%c2_i32_10, %c0_i32_11] : memref<8x128xf32, #tpu.memory_space<vmem>> -> memref<1x128xf32, #tpu.memory_space<vmem>>
    %20 = tpu.memref_slice %arg6[%c2_i32_8] : memref<8x!tpu.dma_semaphore, #tpu.memory_space<semaphore_mem>> -> memref<1x!tpu.dma_semaphore, #tpu.memory_space<semaphore_mem>>
    %21 = tpu.memref_squeeze %20 : memref<1x!tpu.dma_semaphore, #tpu.memory_space<semaphore_mem>> -> memref<!tpu.dma_semaphore, #tpu.memory_space<semaphore_mem>>
    tpu.enqueue_dma source(%18 : memref<1x128xf32, #tpu.memory_space<any>>) target(%19 : memref<1x128xf32, #tpu.memory_space<vmem>>) target_semaphore(%21 : memref<!tpu.dma_semaphore, #tpu.memory_space<semaphore_mem>>)
    %c3_i32 = arith.constant 3 : i32
    %22 = arith.addi %0, %c3_i32 : i32
    %23 = arith.index_cast %22 : i32 to index
    %24 = memref.load %arg1[%23] : memref<8xi32, #tpu.memory_space<smem>>
    %c3_i32_12 = arith.constant 3 : i32
    %c0_i32_13 = arith.constant 0 : i32
    %25 = tpu.memref_slice %arg3[%24, %c0_i32_13] : memref<256x128xf32, #tpu.memory_space<any>> -> memref<1x128xf32, #tpu.memory_space<any>>
    %c3_i32_14 = arith.constant 3 : i32
    %c0_i32_15 = arith.constant 0 : i32
    %26 = tpu.memref_slice %arg5[%c3_i32_14, %c0_i32_15] : memref<8x128xf32, #tpu.memory_space<vmem>> -> memref<1x128xf32, #tpu.memory_space<vmem>>
    %27 = tpu.memref_slice %arg6[%c3_i32_12] : memref<8x!tpu.dma_semaphore, #tpu.memory_space<semaphore_mem>> -> memref<1x!tpu.dma_semaphore, #tpu.memory_space<semaphore_mem>>
    %28 = tpu.memref_squeeze %27 : memref<1x!tpu.dma_semaphore, #tpu.memory_space<semaphore_mem>> -> memref<!tpu.dma_semaphore, #tpu.memory_space<semaphore_mem>>
    tpu.enqueue_dma source(%25 : memref<1x128xf32, #tpu.memory_space<any>>) target(%26 : memref<1x128xf32, #tpu.memory_space<vmem>>) target_semaphore(%28 : memref<!tpu.dma_semaphore, #tpu.memory_space<semaphore_mem>>)
    %c4_i32 = arith.constant 4 : i32
    %29 = arith.addi %0, %c4_i32 : i32
    %30 = arith.index_cast %29 : i32 to index
    %31 = memref.load %arg1[%30] : memref<8xi32, #tpu.memory_space<smem>>
    %c4_i32_16 = arith.constant 4 : i32
    %c0_i32_17 = arith.constant 0 : i32
    %32 = tpu.memref_slice %arg3[%31, %c0_i32_17] : memref<256x128xf32, #tpu.memory_space<any>> -> memref<1x128xf32, #tpu.memory_space<any>>
    %c4_i32_18 = arith.constant 4 : i32
    %c0_i32_19 = arith.constant 0 : i32
    %33 = tpu.memref_slice %arg5[%c4_i32_18, %c0_i32_19] : memref<8x128xf32, #tpu.memory_space<vmem>> -> memref<1x128xf32, #tpu.memory_space<vmem>>
    %34 = tpu.memref_slice %arg6[%c4_i32_16] : memref<8x!tpu.dma_semaphore, #tpu.memory_space<semaphore_mem>> -> memref<1x!tpu.dma_semaphore, #tpu.memory_space<semaphore_mem>>
    %35 = tpu.memref_squeeze %34 : memref<1x!tpu.dma_semaphore, #tpu.memory_space<semaphore_mem>> -> memref<!tpu.dma_semaphore, #tpu.memory_space<semaphore_mem>>
    tpu.enqueue_dma source(%32 : memref<1x128xf32, #tpu.memory_space<any>>) target(%33 : memref<1x128xf32, #tpu.memory_space<vmem>>) target_semaphore(%35 : memref<!tpu.dma_semaphore, #tpu.memory_space<semaphore_mem>>)
    %c5_i32 = arith.constant 5 : i32
    %36 = arith.addi %0, %c5_i32 : i32
    %37 = arith.index_cast %36 : i32 to index
    %38 = memref.load %arg1[%37] : memref<8xi32, #tpu.memory_space<smem>>
    %c5_i32_20 = arith.constant 5 : i32
    %c0_i32_21 = arith.constant 0 : i32
    %39 = tpu.memref_slice %arg3[%38, %c0_i32_21] : memref<256x128xf32, #tpu.memory_space<any>> -> memref<1x128xf32, #tpu.memory_space<any>>
    %c5_i32_22 = arith.constant 5 : i32
    %c0_i32_23 = arith.constant 0 : i32
    %40 = tpu.memref_slice %arg5[%c5_i32_22, %c0_i32_23] : memref<8x128xf32, #tpu.memory_space<vmem>> -> memref<1x128xf32, #tpu.memory_space<vmem>>
    %41 = tpu.memref_slice %arg6[%c5_i32_20] : memref<8x!tpu.dma_semaphore, #tpu.memory_space<semaphore_mem>> -> memref<1x!tpu.dma_semaphore, #tpu.memory_space<semaphore_mem>>
    %42 = tpu.memref_squeeze %41 : memref<1x!tpu.dma_semaphore, #tpu.memory_space<semaphore_mem>> -> memref<!tpu.dma_semaphore, #tpu.memory_space<semaphore_mem>>
    tpu.enqueue_dma source(%39 : memref<1x128xf32, #tpu.memory_space<any>>) target(%40 : memref<1x128xf32, #tpu.memory_space<vmem>>) target_semaphore(%42 : memref<!tpu.dma_semaphore, #tpu.memory_space<semaphore_mem>>)
    %c6_i32 = arith.constant 6 : i32
    %43 = arith.addi %0, %c6_i32 : i32
    %44 = arith.index_cast %43 : i32 to index
    %45 = memref.load %arg1[%44] : memref<8xi32, #tpu.memory_space<smem>>
    %c6_i32_24 = arith.constant 6 : i32
    %c0_i32_25 = arith.constant 0 : i32
    %46 = tpu.memref_slice %arg3[%45, %c0_i32_25] : memref<256x128xf32, #tpu.memory_space<any>> -> memref<1x128xf32, #tpu.memory_space<any>>
    %c6_i32_26 = arith.constant 6 : i32
    %c0_i32_27 = arith.constant 0 : i32
    %47 = tpu.memref_slice %arg5[%c6_i32_26, %c0_i32_27] : memref<8x128xf32, #tpu.memory_space<vmem>> -> memref<1x128xf32, #tpu.memory_space<vmem>>
    %48 = tpu.memref_slice %arg6[%c6_i32_24] : memref<8x!tpu.dma_semaphore, #tpu.memory_space<semaphore_mem>> -> memref<1x!tpu.dma_semaphore, #tpu.memory_space<semaphore_mem>>
    %49 = tpu.memref_squeeze %48 : memref<1x!tpu.dma_semaphore, #tpu.memory_space<semaphore_mem>> -> memref<!tpu.dma_semaphore, #tpu.memory_space<semaphore_mem>>
    tpu.enqueue_dma source(%46 : memref<1x128xf32, #tpu.memory_space<any>>) target(%47 : memref<1x128xf32, #tpu.memory_space<vmem>>) target_semaphore(%49 : memref<!tpu.dma_semaphore, #tpu.memory_space<semaphore_mem>>)
    %c7_i32 = arith.constant 7 : i32
    %50 = arith.addi %0, %c7_i32 : i32
    %51 = arith.index_cast %50 : i32 to index
    %52 = memref.load %arg1[%51] : memref<8xi32, #tpu.memory_space<smem>>
    %c7_i32_28 = arith.constant 7 : i32
    %c0_i32_29 = arith.constant 0 : i32
    %53 = tpu.memref_slice %arg3[%52, %c0_i32_29] : memref<256x128xf32, #tpu.memory_space<any>> -> memref<1x128xf32, #tpu.memory_space<any>>
    %c7_i32_30 = arith.constant 7 : i32
    %c0_i32_31 = arith.constant 0 : i32
    %54 = tpu.memref_slice %arg5[%c7_i32_30, %c0_i32_31] : memref<8x128xf32, #tpu.memory_space<vmem>> -> memref<1x128xf32, #tpu.memory_space<vmem>>
    %55 = tpu.memref_slice %arg6[%c7_i32_28] : memref<8x!tpu.dma_semaphore, #tpu.memory_space<semaphore_mem>> -> memref<1x!tpu.dma_semaphore, #tpu.memory_space<semaphore_mem>>
    %56 = tpu.memref_squeeze %55 : memref<1x!tpu.dma_semaphore, #tpu.memory_space<semaphore_mem>> -> memref<!tpu.dma_semaphore, #tpu.memory_space<semaphore_mem>>
    tpu.enqueue_dma source(%53 : memref<1x128xf32, #tpu.memory_space<any>>) target(%54 : memref<1x128xf32, #tpu.memory_space<vmem>>) target_semaphore(%56 : memref<!tpu.dma_semaphore, #tpu.memory_space<semaphore_mem>>)
    %c0_i32_32 = arith.constant 0 : i32
    %c0_i32_33 = arith.constant 0 : i32
    %57 = tpu.memref_slice %arg3[%3, %c0_i32_33] : memref<256x128xf32, #tpu.memory_space<any>> -> memref<1x128xf32, #tpu.memory_space<any>>
    %c0_i32_34 = arith.constant 0 : i32
    %c0_i32_35 = arith.constant 0 : i32
    %58 = tpu.memref_slice %arg5[%c0_i32_34, %c0_i32_35] : memref<8x128xf32, #tpu.memory_space<vmem>> -> memref<1x128xf32, #tpu.memory_space<vmem>>
    %59 = tpu.memref_slice %arg6[%c0_i32_32] : memref<8x!tpu.dma_semaphore, #tpu.memory_space<semaphore_mem>> -> memref<1x!tpu.dma_semaphore, #tpu.memory_space<semaphore_mem>>
    %60 = tpu.memref_squeeze %59 : memref<1x!tpu.dma_semaphore, #tpu.memory_space<semaphore_mem>> -> memref<!tpu.dma_semaphore, #tpu.memory_space<semaphore_mem>>
    tpu.wait_dma2 semaphore(%60 : memref<!tpu.dma_semaphore, #tpu.memory_space<semaphore_mem>>) src(%57 : memref<1x128xf32, #tpu.memory_space<any>>) dst(%58 : memref<1x128xf32, #tpu.memory_space<vmem>>)
    %c1_i32_36 = arith.constant 1 : i32
    %c0_i32_37 = arith.constant 0 : i32
    %61 = tpu.memref_slice %arg3[%10, %c0_i32_37] : memref<256x128xf32, #tpu.memory_space<any>> -> memref<1x128xf32, #tpu.memory_space<any>>
    %c1_i32_38 = arith.constant 1 : i32
    %c0_i32_39 = arith.constant 0 : i32
    %62 = tpu.memref_slice %arg5[%c1_i32_38, %c0_i32_39] : memref<8x128xf32, #tpu.memory_space<vmem>> -> memref<1x128xf32, #tpu.memory_space<vmem>>
    %63 = tpu.memref_slice %arg6[%c1_i32_36] : memref<8x!tpu.dma_semaphore, #tpu.memory_space<semaphore_mem>> -> memref<1x!tpu.dma_semaphore, #tpu.memory_space<semaphore_mem>>
    %64 = tpu.memref_squeeze %63 : memref<1x!tpu.dma_semaphore, #tpu.memory_space<semaphore_mem>> -> memref<!tpu.dma_semaphore, #tpu.memory_space<semaphore_mem>>
    tpu.wait_dma2 semaphore(%64 : memref<!tpu.dma_semaphore, #tpu.memory_space<semaphore_mem>>) src(%61 : memref<1x128xf32, #tpu.memory_space<any>>) dst(%62 : memref<1x128xf32, #tpu.memory_space<vmem>>)
    %c2_i32_40 = arith.constant 2 : i32
    %c0_i32_41 = arith.constant 0 : i32
    %65 = tpu.memref_slice %arg3[%17, %c0_i32_41] : memref<256x128xf32, #tpu.memory_space<any>> -> memref<1x128xf32, #tpu.memory_space<any>>
    %c2_i32_42 = arith.constant 2 : i32
    %c0_i32_43 = arith.constant 0 : i32
    %66 = tpu.memref_slice %arg5[%c2_i32_42, %c0_i32_43] : memref<8x128xf32, #tpu.memory_space<vmem>> -> memref<1x128xf32, #tpu.memory_space<vmem>>
    %67 = tpu.memref_slice %arg6[%c2_i32_40] : memref<8x!tpu.dma_semaphore, #tpu.memory_space<semaphore_mem>> -> memref<1x!tpu.dma_semaphore, #tpu.memory_space<semaphore_mem>>
    %68 = tpu.memref_squeeze %67 : memref<1x!tpu.dma_semaphore, #tpu.memory_space<semaphore_mem>> -> memref<!tpu.dma_semaphore, #tpu.memory_space<semaphore_mem>>
    tpu.wait_dma2 semaphore(%68 : memref<!tpu.dma_semaphore, #tpu.memory_space<semaphore_mem>>) src(%65 : memref<1x128xf32, #tpu.memory_space<any>>) dst(%66 : memref<1x128xf32, #tpu.memory_space<vmem>>)
    %c3_i32_44 = arith.constant 3 : i32
    %c0_i32_45 = arith.constant 0 : i32
    %69 = tpu.memref_slice %arg3[%24, %c0_i32_45] : memref<256x128xf32, #tpu.memory_space<any>> -> memref<1x128xf32, #tpu.memory_space<any>>
    %c3_i32_46 = arith.constant 3 : i32
    %c0_i32_47 = arith.constant 0 : i32
    %70 = tpu.memref_slice %arg5[%c3_i32_46, %c0_i32_47] : memref<8x128xf32, #tpu.memory_space<vmem>> -> memref<1x128xf32, #tpu.memory_space<vmem>>
    %71 = tpu.memref_slice %arg6[%c3_i32_44] : memref<8x!tpu.dma_semaphore, #tpu.memory_space<semaphore_mem>> -> memref<1x!tpu.dma_semaphore, #tpu.memory_space<semaphore_mem>>
    %72 = tpu.memref_squeeze %71 : memref<1x!tpu.dma_semaphore, #tpu.memory_space<semaphore_mem>> -> memref<!tpu.dma_semaphore, #tpu.memory_space<semaphore_mem>>
    tpu.wait_dma2 semaphore(%72 : memref<!tpu.dma_semaphore, #tpu.memory_space<semaphore_mem>>) src(%69 : memref<1x128xf32, #tpu.memory_space<any>>) dst(%70 : memref<1x128xf32, #tpu.memory_space<vmem>>)
    %c4_i32_48 = arith.constant 4 : i32
    %c0_i32_49 = arith.constant 0 : i32
    %73 = tpu.memref_slice %arg3[%31, %c0_i32_49] : memref<256x128xf32, #tpu.memory_space<any>> -> memref<1x128xf32, #tpu.memory_space<any>>
    %c4_i32_50 = arith.constant 4 : i32
    %c0_i32_51 = arith.constant 0 : i32
    %74 = tpu.memref_slice %arg5[%c4_i32_50, %c0_i32_51] : memref<8x128xf32, #tpu.memory_space<vmem>> -> memref<1x128xf32, #tpu.memory_space<vmem>>
    %75 = tpu.memref_slice %arg6[%c4_i32_48] : memref<8x!tpu.dma_semaphore, #tpu.memory_space<semaphore_mem>> -> memref<1x!tpu.dma_semaphore, #tpu.memory_space<semaphore_mem>>
    %76 = tpu.memref_squeeze %75 : memref<1x!tpu.dma_semaphore, #tpu.memory_space<semaphore_mem>> -> memref<!tpu.dma_semaphore, #tpu.memory_space<semaphore_mem>>
    tpu.wait_dma2 semaphore(%76 : memref<!tpu.dma_semaphore, #tpu.memory_space<semaphore_mem>>) src(%73 : memref<1x128xf32, #tpu.memory_space<any>>) dst(%74 : memref<1x128xf32, #tpu.memory_space<vmem>>)
    %c5_i32_52 = arith.constant 5 : i32
    %c0_i32_53 = arith.constant 0 : i32
    %77 = tpu.memref_slice %arg3[%38, %c0_i32_53] : memref<256x128xf32, #tpu.memory_space<any>> -> memref<1x128xf32, #tpu.memory_space<any>>
    %c5_i32_54 = arith.constant 5 : i32
    %c0_i32_55 = arith.constant 0 : i32
    %78 = tpu.memref_slice %arg5[%c5_i32_54, %c0_i32_55] : memref<8x128xf32, #tpu.memory_space<vmem>> -> memref<1x128xf32, #tpu.memory_space<vmem>>
    %79 = tpu.memref_slice %arg6[%c5_i32_52] : memref<8x!tpu.dma_semaphore, #tpu.memory_space<semaphore_mem>> -> memref<1x!tpu.dma_semaphore, #tpu.memory_space<semaphore_mem>>
    %80 = tpu.memref_squeeze %79 : memref<1x!tpu.dma_semaphore, #tpu.memory_space<semaphore_mem>> -> memref<!tpu.dma_semaphore, #tpu.memory_space<semaphore_mem>>
    tpu.wait_dma2 semaphore(%80 : memref<!tpu.dma_semaphore, #tpu.memory_space<semaphore_mem>>) src(%77 : memref<1x128xf32, #tpu.memory_space<any>>) dst(%78 : memref<1x128xf32, #tpu.memory_space<vmem>>)
    %c6_i32_56 = arith.constant 6 : i32
    %c0_i32_57 = arith.constant 0 : i32
    %81 = tpu.memref_slice %arg3[%45, %c0_i32_57] : memref<256x128xf32, #tpu.memory_space<any>> -> memref<1x128xf32, #tpu.memory_space<any>>
    %c6_i32_58 = arith.constant 6 : i32
    %c0_i32_59 = arith.constant 0 : i32
    %82 = tpu.memref_slice %arg5[%c6_i32_58, %c0_i32_59] : memref<8x128xf32, #tpu.memory_space<vmem>> -> memref<1x128xf32, #tpu.memory_space<vmem>>
    %83 = tpu.memref_slice %arg6[%c6_i32_56] : memref<8x!tpu.dma_semaphore, #tpu.memory_space<semaphore_mem>> -> memref<1x!tpu.dma_semaphore, #tpu.memory_space<semaphore_mem>>
    %84 = tpu.memref_squeeze %83 : memref<1x!tpu.dma_semaphore, #tpu.memory_space<semaphore_mem>> -> memref<!tpu.dma_semaphore, #tpu.memory_space<semaphore_mem>>
    tpu.wait_dma2 semaphore(%84 : memref<!tpu.dma_semaphore, #tpu.memory_space<semaphore_mem>>) src(%81 : memref<1x128xf32, #tpu.memory_space<any>>) dst(%82 : memref<1x128xf32, #tpu.memory_space<vmem>>)
    %c7_i32_60 = arith.constant 7 : i32
    %c0_i32_61 = arith.constant 0 : i32
    %85 = tpu.memref_slice %arg3[%52, %c0_i32_61] : memref<256x128xf32, #tpu.memory_space<any>> -> memref<1x128xf32, #tpu.memory_space<any>>
    %c7_i32_62 = arith.constant 7 : i32
    %c0_i32_63 = arith.constant 0 : i32
    %86 = tpu.memref_slice %arg5[%c7_i32_62, %c0_i32_63] : memref<8x128xf32, #tpu.memory_space<vmem>> -> memref<1x128xf32, #tpu.memory_space<vmem>>
    %87 = tpu.memref_slice %arg6[%c7_i32_60] : memref<8x!tpu.dma_semaphore, #tpu.memory_space<semaphore_mem>> -> memref<1x!tpu.dma_semaphore, #tpu.memory_space<semaphore_mem>>
    %88 = tpu.memref_squeeze %87 : memref<1x!tpu.dma_semaphore, #tpu.memory_space<semaphore_mem>> -> memref<!tpu.dma_semaphore, #tpu.memory_space<semaphore_mem>>
    tpu.wait_dma2 semaphore(%88 : memref<!tpu.dma_semaphore, #tpu.memory_space<semaphore_mem>>) src(%85 : memref<1x128xf32, #tpu.memory_space<any>>) dst(%86 : memref<1x128xf32, #tpu.memory_space<vmem>>)
    %c0 = arith.constant 0 : index
    %89 = memref.load %arg2[%c0] : memref<1xi32, #tpu.memory_space<smem>>
    %90 = tpu.iota {dimensions = array<i32: 0>} : vector<8x1xi32>
    %91 = vector.broadcast %0 : i32 to vector<8x1xi32>
    %92 = arith.addi %91, %90 : vector<8x1xi32>
    %93 = vector.broadcast %89 : i32 to vector<8x1xi32>
    %94 = arith.cmpi slt, %92, %93 : vector<8x1xi32>
    %cst = arith.constant 1.000000e+00 : f32
    %cst_64 = arith.constant -1.000000e+00 : f32
    %95 = vector.broadcast %cst : f32 to vector<8x1xf32>
    %96 = vector.broadcast %cst_64 : f32 to vector<8x1xf32>
    %97 = arith.select %94, %95, %96 : vector<8x1xi1>, vector<8x1xf32>
    %c0_65 = arith.constant 0 : index
    %c0_66 = arith.constant 0 : index
    %98 = vector.load %arg5[%c0_65, %c0_66] : memref<8x128xf32, #tpu.memory_space<vmem>>, vector<8x128xf32>
    %99 = vector.broadcast %97 : vector<8x1xf32> to vector<8x128xf32>
    %100 = arith.mulf %98, %99 : vector<8x128xf32>
    %c0_67 = arith.constant 0 : index
    %c0_68 = arith.constant 0 : index
    %101 = vector.load %arg4[%c0_67, %c0_68] : memref<8x128xf32, #tpu.memory_space<vmem>>, vector<8x128xf32>
    tpu.vector_store %arg4[%c0_67, %c0_68], %100 {strides = array<i32>} : memref<8x128xf32, #tpu.memory_space<vmem>>, vector<8x128xf32>,
    return
  }
  func.func @transform_1(%arg0: i32, %arg1: memref<8xi32, #tpu.memory_space<smem>>, %arg2: memref<1xi32, #tpu.memory_space<smem>>) -> (i32, i32) {
    %c0_i32 = arith.constant 0 : i32
    %c0_i32_0 = arith.constant 0 : i32
    return %arg0, %c0_i32 : i32, i32
  }
}

</mosaic_0001>

<bundles_post_ra>
// kernel: tpu_custom_call.1
= control target key start
LH: loop header
LB: loop body
LE: loop exit
PB: predicated region body
PF: predicated region fallthrough
CT: control target
= control target key end

     0   :  { %s720_s0 = inlined_call_operand.vmem [shape: s32[8], index: 0, kind: input, shape index: {}]   ;;  %s721_s1 = inlined_call_operand.<no memory space> [shape: s32[1], index: 1, kind: input, shape index: {}]   ;;  %s722_s2 = inlined_call_operand.hbm [shape: f32[256,128], index: 2, kind: input, shape index: {}]   ;;  %s723_s3 = inlined_call_operand.hbm [shape: f32[8,128], index: 3, kind: output, shape index: {}]  }
   0x1   :  { %s8_s14 = sshll.u32 %s720_s0, 4  ;;  %s9_s14 = int_to_ptr.vmem [resolvable:$true] %s8_s14 }
   0x2   :  { %s297_s15 = scalar_lea.vmem %s9_s14, 16  ;;  %p302_p1 = scmp.lt.s32.totalorder %s9_s14, %s9_s14 }
   0x3   :  { %p298_p0 = scmp.ne.s32.totalorder %s9_s14, %s297_s15  ;;  %p303_p2 = scmp.lt.s32.totalorder %s297_s15, %s297_s15 }
   0x5   :  { %p304_p3 = por %p303_p2, %p302_p1 }
   0x7   :  { %p305_p4 = pnand %p304_p3, %p298_p0 }
   0x9   :  { %308 = shalt.err (!%p305_p4)  }
   0xa   :  { %s543_s16 = smov [#allocation5]  }
   0xb   :  { %11 = dma.vmem_to_smem %s9_s14, 16, %s543_s16, [#allocation4] }
   0xc   :  { %523 = dma.done.wait [#allocation4], 16 }
   0xd   :  { %524 = vsyncadd [#allocation4], 4294967280 }
   0xe   :  { %14 = sfence }
   0xf   :  { %15 = vsyncpa [#allocation8], 0  ;;  %s17_s17 = sld [smem:[#allocation5]]  ;;  %s544_s18 = smov [#allocation2]  }
  0x10   :  { %s27_s19 = sshll.u32 %s544_s18, 4  ;;  %s577_s20 = sld [smem:[#allocation5 + $0x1]]  ;;  %s579_s19 = int_to_ptr.vmem [resolvable:$true] %s27_s19 }
  0x11   :  { %s545_s0 = smov [#allocation2 + $0x1]   ;;  %s581_s22 = sld [smem:[#allocation5 + $0x2]] }
  0x12   :  { %s44_s21 = sshll.u32 %s545_s0, 4  ;;  %s546_s23 = smov [#allocation2 + $0x2]   ;;  %s583_s21 = int_to_ptr.vmem [resolvable:$true] %s44_s21 }
  0x13   :  { %s61_s24 = sshll.u32 %s546_s23, 4  ;;  %s585_s25 = sld [smem:[#allocation5 + $0x3]]  ;;  %s587_s24 = int_to_ptr.vmem [resolvable:$true] %s61_s24 }
  0x14   :  { %s596_s7 = scalar_lea.hbm %s722_s2, 4096 }
  0x15   :  { %s263_s26 = sshll.u32 %s17_s17, 4 }
  0x16   :  { %s19_s29 = scalar_lea.hbm %s722_s2, %s263_s26  ;;  %s265_s30 = sshll.u32 %s577_s20, 4 }
  0x17   :  { %s309_s4 = scalar_lea.hbm %s19_s29, 16  ;;  %p312_p6 = scmp.lt.u32.totalorder %s19_s29, %s722_s2 }
  0x18   :  { %p310_p5 = scmp.ne.s32.totalorder %s19_s29, %s309_s4  ;;  %p313_p7 = scmp.lt.u32.totalorder %s596_s7, %s309_s4 }
  0x19   :  { %p315_p9 = scmp.lt.u32.totalorder %s309_s4, %s19_s29 }
  0x1a   :  { %p314_p8 = por %p313_p7, %p312_p6 }
  0x1c   :  { %p316_p10 = por %p315_p9, %p314_p8 }
  0x1e   :  { %p317_p11 = pnand %p316_p10, %p310_p5 }
  0x20   :  { %320 = shalt.err (!%p317_p11)  }
  0x21   :  { %s321_s10 = scalar_lea.vmem %s579_s19, 16  ;;  %s605_s11 = scalar_lea.vmem %s579_s19, 128 }
  0x22   :  { %p322_p12 = scmp.ne.s32.totalorder %s579_s19, %s321_s10  ;;  %p326_p13 = scmp.lt.s32.totalorder %s579_s19, %s579_s19 }
  0x23   :  { %p327_p0 = scmp.lt.s32.totalorder %s605_s11, %s321_s10 }
  0x25   :  { %p328_p1 = por %p327_p0, %p326_p13 }
  0x27   :  { %p329_p2 = pnand %p328_p1, %p322_p12 }
  0x29   :  { %332 = shalt.err (!%p329_p2)  }
  0x2a   :  { %30 = dma.hbm_to_vmem [thread:$0]  %s19_s29, 16, %s579_s19, [#allocation3] }
  0x2b   :  { %s34_s14 = scalar_lea.hbm %s722_s2, %s265_s30  ;;  %s267_s15 = sshll.u32 %s581_s22, 4 }
  0x2c   :  { %s333_s16 = scalar_lea.hbm %s34_s14, 16  ;;  %p336_p4 = scmp.lt.u32.totalorder %s34_s14, %s722_s2 }
  0x2d   :  { %p334_p3 = scmp.ne.s32.totalorder %s34_s14, %s333_s16  ;;  %p337_p5 = scmp.lt.u32.totalorder %s596_s7, %s333_s16 }
  0x2e   :  { %p339_p7 = scmp.lt.u32.totalorder %s333_s16, %s34_s14 }
  0x2f   :  { %p338_p6 = por %p337_p5, %p336_p4 }
  0x31   :  { %p340_p8 = por %p339_p7, %p338_p6 }
  0x33   :  { %p341_p9 = pnand %p340_p8, %p334_p3 }
  0x35   :  { %344 = shalt.err (!%p341_p9)  }
  0x36   :  { %s345_s20 = scalar_lea.vmem %s583_s21, 16  ;;  %p350_p11 = scmp.lt.s32.totalorder %s583_s21, %s579_s19 }
  0x37   :  { %p346_p10 = scmp.ne.s32.totalorder %s583_s21, %s345_s20  ;;  %p351_p12 = scmp.lt.s32.totalorder %s605_s11, %s345_s20 }
  0x39   :  { %p352_p13 = por %p351_p12, %p350_p11 }
  0x3b   :  { %p353_p0 = pnand %p352_p13, %p346_p10 }
  0x3d   :  { %356 = shalt.err (!%p353_p0)  }
  0x3e   :  { %47 = dma.hbm_to_vmem [thread:$0]  %s34_s14, 16, %s583_s21, [#allocation3 + $0x1] }
  0x3f   :  { %s51_s23 = scalar_lea.hbm %s722_s2, %s267_s15  ;;  %s269_s26 = sshll.u32 %s585_s25, 4 }
  0x40   :  { %s357_s27 = scalar_lea.hbm %s51_s23, 16  ;;  %p360_p2 = scmp.lt.u32.totalorder %s51_s23, %s722_s2 }
  0x41   :  { %p358_p1 = scmp.ne.s32.totalorder %s51_s23, %s357_s27  ;;  %p361_p3 = scmp.lt.u32.totalorder %s596_s7, %s357_s27 }
  0x42   :  { %p363_p5 = scmp.lt.u32.totalorder %s357_s27, %s51_s23 }
  0x43   :  { %p362_p4 = por %p361_p3, %p360_p2 }
  0x45   :  { %p364_p6 = por %p363_p5, %p362_p4 }
  0x47   :  { %p365_p7 = pnand %p364_p6, %p358_p1 }
  0x49   :  { %368 = shalt.err (!%p365_p7)  }
  0x4a   :  { %s369_s21 = scalar_lea.vmem %s587_s24, 16  ;;  %p374_p9 = scmp.lt.s32.totalorder %s587_s24, %s579_s19 }
  0x4b   :  { %p370_p8 = scmp.ne.s32.totalorder %s587_s24, %s369_s21  ;;  %p375_p10 = scmp.lt.s32.totalorder %s605_s11, %s369_s21 }
  0x4d   :  { %p376_p11 = por %p375_p10, %p374_p9 }
  0x4f   :  { %p377_p12 = pnand %p376_p11, %p370_p8 }
  0x51   :  { %380 = shalt.err (!%p377_p12)  }
  0x52   :  { %64 = dma.hbm_to_vmem [thread:$0]  %s51_s23, 16, %s587_s24, [#allocation3 + $0x2] }
  0x53   :  { %s68_s4 = scalar_lea.hbm %s722_s2, %s269_s26  ;;  %s547_s5 = smov [#allocation2 + $0x3]  }
  0x54   :  { %s78_s6 = sshll.u32 %s547_s5, 4  ;;  %s642_s8 = sld [smem:[#allocation5 + $0x4]]  ;;  %s79_s6 = int_to_ptr.vmem [resolvable:$true] %s78_s6 }
  0x55   :  { %s381_s9 = scalar_lea.hbm %s68_s4, 16  ;;  %p384_p0 = scmp.lt.u32.totalorder %s68_s4, %s722_s2 }
  0x56   :  { %p382_p13 = scmp.ne.s32.totalorder %s68_s4, %s381_s9  ;;  %p385_p1 = scmp.lt.u32.totalorder %s596_s7, %s381_s9 }
  0x57   :  { %p387_p3 = scmp.lt.u32.totalorder %s381_s9, %s68_s4 }
  0x58   :  { %p386_p2 = por %p385_p1, %p384_p0 }
  0x5a   :  { %p388_p4 = por %p387_p3, %p386_p2 }
  0x5c   :  { %p389_p5 = pnand %p388_p4, %p382_p13 }
  0x5e   :  { %392 = shalt.err (!%p389_p5)  }
  0x5f   :  { %s393_s24 = scalar_lea.vmem %s79_s6, 16  ;;  %p398_p7 = scmp.lt.s32.totalorder %s79_s6, %s579_s19 }
  0x60   :  { %p394_p6 = scmp.ne.s32.totalorder %s79_s6, %s393_s24  ;;  %p399_p8 = scmp.lt.s32.totalorder %s605_s11, %s393_s24 }
  0x62   :  { %p400_p9 = por %p399_p8, %p398_p7 }
  0x64   :  { %p401_p10 = pnand %p400_p9, %p394_p6 }
  0x66   :  { %404 = shalt.err (!%p401_p10)  }
  0x67   :  { %81 = dma.hbm_to_vmem [thread:$0]  %s68_s4, 16, %s79_s6, [#allocation3 + $0x3] }
  0x68   :  { %s548_s13 = smov [#allocation2 + $0x4]   ;;  %s650_s15 = sld [smem:[#allocation5 + $0x5]] }
  0x69   :  { %s95_s14 = sshll.u32 %s548_s13, 4  ;;  %s549_s16 = smov [#allocation2 + $0x5]   ;;  %s96_s14 = int_to_ptr.vmem [resolvable:$true] %s95_s14 }
  0x6a   :  { %s112_s17 = sshll.u32 %s549_s16, 4  ;;  %s652_s18 = sld [smem:[#allocation5 + $0x6]]  ;;  %s655_s17 = int_to_ptr.vmem [resolvable:$true] %s112_s17 }
  0x6b   :  { %s271_s20 = sshll.u32 %s642_s8, 4 }
  0x6c   :  { %s85_s23 = scalar_lea.hbm %s722_s2, %s271_s20 }
  0x6d   :  { %s405_s26 = scalar_lea.hbm %s85_s23, 16  ;;  %p408_p12 = scmp.lt.u32.totalorder %s85_s23, %s722_s2 }
  0x6e   :  { %p406_p11 = scmp.ne.s32.totalorder %s85_s23, %s405_s26  ;;  %p409_p13 = scmp.lt.u32.totalorder %s596_s7, %s405_s26 }
  0x6f   :  { %p411_p1 = scmp.lt.u32.totalorder %s405_s26, %s85_s23 }
  0x70   :  { %p410_p0 = por %p409_p13, %p408_p12 }
  0x72   :  { %p412_p2 = por %p411_p1, %p410_p0 }
  0x74   :  { %p413_p3 = pnand %p412_p2, %p406_p11 }
  0x76   :  { %416 = shalt.err (!%p413_p3)  }
  0x77   :  { %s417_s29 = scalar_lea.vmem %s96_s14, 16  ;;  %p422_p5 = scmp.lt.s32.totalorder %s96_s14, %s579_s19 }
  0x78   :  { %p418_p4 = scmp.ne.s32.totalorder %s96_s14, %s417_s29  ;;  %p423_p6 = scmp.lt.s32.totalorder %s605_s11, %s417_s29 }
  0x7a   :  { %p424_p7 = por %p423_p6, %p422_p5 }
  0x7c   :  { %p425_p8 = pnand %p424_p7, %p418_p4 }
  0x7e   :  { %428 = shalt.err (!%p425_p8)  }
  0x7f   :  { %98 = dma.hbm_to_vmem [thread:$0]  %s85_s23, 16, %s96_s14, [#allocation3 + $0x4] }
  0x80   :  { %s273_s21 = sshll.u32 %s650_s15, 4  ;;  %s550_s25 = smov [#allocation2 + $0x6]  }
  0x81   :  { %s129_s30 = sshll.u32 %s550_s25, 4  ;;  %s102_s6 = scalar_lea.hbm %s722_s2, %s273_s21  ;;  %s670_s30 = int_to_ptr.vmem [resolvable:$true] %s129_s30 }
  0x82   :  { %s429_s8 = scalar_lea.hbm %s102_s6, 16  ;;  %p432_p10 = scmp.lt.u32.totalorder %s102_s6, %s722_s2 }
  0x83   :  { %p430_p9 = scmp.ne.s32.totalorder %s102_s6, %s429_s8  ;;  %p433_p11 = scmp.lt.u32.totalorder %s596_s7, %s429_s8 }
  0x84   :  { %p435_p13 = scmp.lt.u32.totalorder %s429_s8, %s102_s6 }
  0x85   :  { %p434_p12 = por %p433_p11, %p432_p10 }
  0x87   :  { %p436_p0 = por %p435_p13, %p434_p12 }
  0x89   :  { %p437_p1 = pnand %p436_p0, %p430_p9 }
  0x8b   :  { %440 = shalt.err (!%p437_p1)  }
  0x8c   :  { %s441_s12 = scalar_lea.vmem %s655_s17, 16  ;;  %p446_p3 = scmp.lt.s32.totalorder %s655_s17, %s579_s19 }
  0x8d   :  { %p442_p2 = scmp.ne.s32.totalorder %s655_s17, %s441_s12  ;;  %p447_p4 = scmp.lt.s32.totalorder %s605_s11, %s441_s12 }
  0x8f   :  { %p448_p5 = por %p447_p4, %p446_p3 }
  0x91   :  { %p449_p6 = pnand %p448_p5, %p442_p2 }
  0x93   :  { %452 = shalt.err (!%p449_p6)  }
  0x94   :  { %115 = dma.hbm_to_vmem [thread:$0]  %s102_s6, 16, %s655_s17, [#allocation3 + $0x5] }
  0x95   :  { %s275_s24 = sshll.u32 %s652_s18, 4  ;;  %s276_s13 = sld [smem:[#allocation5 + $0x7]] }
  0x96   :  { %s119_s16 = scalar_lea.hbm %s722_s2, %s275_s24 }
  0x97   :  { %s453_s20 = scalar_lea.hbm %s119_s16, 16  ;;  %p456_p8 = scmp.lt.u32.totalorder %s119_s16, %s722_s2 }
  0x98   :  { %p454_p7 = scmp.ne.s32.totalorder %s119_s16, %s453_s20  ;;  %p457_p9 = scmp.lt.u32.totalorder %s596_s7, %s453_s20 }
  0x99   :  { %p459_p11 = scmp.lt.u32.totalorder %s453_s20, %s119_s16 }
  0x9a   :  { %p458_p10 = por %p457_p9, %p456_p8 }
  0x9c   :  { %p460_p12 = por %p459_p11, %p458_p10 }
  0x9e   :  { %p461_p13 = pnand %p460_p12, %p454_p7 }
  0xa0   :  { %464 = shalt.err (!%p461_p13)  }
  0xa1   :  { %s465_s17 = scalar_lea.vmem %s670_s30, 16  ;;  %p470_p1 = scmp.lt.s32.totalorder %s670_s30, %s579_s19 }
  0xa2   :  { %p466_p0 = scmp.ne.s32.totalorder %s670_s30, %s465_s17  ;;  %p471_p2 = scmp.lt.s32.totalorder %s605_s11, %s465_s17 }
  0xa4   :  { %p472_p3 = por %p471_p2, %p470_p1 }
  0xa6   :  { %p473_p4 = pnand %p472_p3, %p466_p0 }
  0xa8   :  { %476 = shalt.err (!%p473_p4)  }
  0xa9   :  { %132 = dma.hbm_to_vmem [thread:$0]  %s119_s16, 16, %s670_s30, [#allocation3 + $0x6] }
  0xaa   :  { %s551_s18 = smov [#allocation2 + $0x7]   ;;  %s277_s26 = sshll.u32 %s276_s13, 4 }
  0xab   :  { %s146_s23 = sshll.u32 %s551_s18, 4  ;;  %s136_s29 = scalar_lea.hbm %s722_s2, %s277_s26  ;;  %s147_s23 = int_to_ptr.vmem [resolvable:$true] %s146_s23 }
  0xac   :  { %s477_s21 = scalar_lea.hbm %s136_s29, 16  ;;  %p480_p6 = scmp.lt.u32.totalorder %s136_s29, %s722_s2 }
  0xad   :  { %p478_p5 = scmp.ne.s32.totalorder %s136_s29, %s477_s21  ;;  %p481_p7 = scmp.lt.u32.totalorder %s596_s7, %s477_s21 }
  0xae   :  { %p483_p9 = scmp.lt.u32.totalorder %s477_s21, %s136_s29 }
  0xaf   :  { %p482_p8 = por %p481_p7, %p480_p6 }
  0xb1   :  { %p484_p10 = por %p483_p9, %p482_p8 }
  0xb3   :  { %p485_p11 = pnand %p484_p10, %p478_p5 }
  0xb5   :  { %488 = shalt.err (!%p485_p11)  }
  0xb6   :  { %s489_s30 = scalar_lea.vmem %s147_s23, 16  ;;  %p494_p13 = scmp.lt.s32.totalorder %s147_s23, %s579_s19 }
  0xb7   :  { %p490_p12 = scmp.ne.s32.totalorder %s147_s23, %s489_s30  ;;  %p495_p0 = scmp.lt.s32.totalorder %s605_s11, %s489_s30 }
  0xb9   :  { %p496_p1 = por %p495_p0, %p494_p13 }
  0xbb   :  { %p497_p2 = pnand %p496_p1, %p490_p12 }
  0xbd   :  { %500 = shalt.err (!%p497_p2)  }
  0xbe   :  { %149 = dma.hbm_to_vmem [thread:$0]  %s136_s29, 16, %s147_s23, [#allocation3 + $0x7] }
  0xbf   :  { %525 = dma.done.wait [#allocation3], 16 }
  0xc0   :  { %526 = vsyncadd [#allocation3], 4294967280 }
  0xc1   :  { %527 = dma.done.wait [#allocation3 + $0x1], 16 }
  0xc2   :  { %528 = vsyncadd [#allocation3 + $0x1], 4294967280 }
  0xc3   :  { %529 = dma.done.wait [#allocation3 + $0x2], 16 }
  0xc4   :  { %530 = vsyncadd [#allocation3 + $0x2], 4294967280 }
  0xc5   :  { %531 = dma.done.wait [#allocation3 + $0x3], 16 }
  0xc6   :  { %532 = vsyncadd [#allocation3 + $0x3], 4294967280 }
  0xc7   :  { %533 = dma.done.wait [#allocation3 + $0x4], 16 }
  0xc8   :  { %534 = vsyncadd [#allocation3 + $0x4], 4294967280 }
  0xc9   :  { %535 = dma.done.wait [#allocation3 + $0x5], 16 }
  0xca   :  { %536 = vsyncadd [#allocation3 + $0x5], 4294967280 }
  0xcb   :  { %537 = dma.done.wait [#allocation3 + $0x6], 16 }
  0xcc   :  { %538 = vsyncadd [#allocation3 + $0x6], 4294967280 }
  0xcd   :  { %539 = dma.done.wait [#allocation3 + $0x7], 16 }
  0xce   :  { %540 = vsyncadd [#allocation3 + $0x7], 4294967280  ;;  %v168_v0 = vlaneseq  ;;  %v172_v1 = vstv %s721_s1  ;;  %v552_v3 = vmov -1.0   ;;  %s553_s7 = smov [#allocation7]   ;;  %v175_v5 = vld [vmem:[#allocation2] sm:$0xff] }
  0xcf   :  { %s184_s11 = sshll.u32 %s553_s7, 4  ;;  %s185_s11 = int_to_ptr.vmem [resolvable:$true] %s184_s11 }
  0xd0   :  { %v169_v2 = vshrl.u32 %v168_v0, 7  ;;  %s501_s5 = scalar_lea.vmem %s185_s11, 128  ;;  %p506_p4 = scmp.lt.s32.totalorder %s185_s11, %s185_s11 }
  0xd1   :  { %p502_p3 = scmp.ne.s32.totalorder %s185_s11, %s501_s5  ;;  %p507_p5 = scmp.lt.s32.totalorder %s501_s5, %s501_s5 }
  0xd2   :  { %vm173_vm0 = vcmp.lt.s32.totalorder %v169_v2, %v172_v1 }
  0xd3   :  { %v174_v4 = vsel %vm173_vm0, 1.0, %v552_v3  ;;  %p508_p6 = por %p507_p5, %p506_p4 }
  0xd4   :  { %v176_v6 = vmul.f32 %v175_v5, %v174_v4 }
  0xd5   :  { %p509_p7 = pnand %p508_p6, %p502_p3 }
  0xd6   :  { %177 = vst [vmem:[#allocation7] sm:$0xff] %v176_v6 }
  0xd7   :  { %512 = shalt.err (!%p509_p7)
}
  0xd8   :  { %s513_s1 = scalar_lea.hbm %s723_s3, 128 }
  0xd9   :  { %p514_p8 = scmp.ne.s32.totalorder %s723_s3, %s513_s1  ;;  %p517_p9 = scmp.lt.u32.totalorder %s513_s1, %s723_s3 }
  0xdb   :  { %p519_p10 = pnand %p517_p9, %p514_p8 }
  0xdd   :  { %522 = shalt.err (!%p519_p10)
}
  0xde   :  { %187 = dma.vmem_to_hbm [thread:$0]  %s185_s11, 128, %s723_s3, [#allocation8]  }
  0xdf   :  { %541 = dma.done.wait [#allocation8], 128  }
  0xe0   :  { %542 = vsyncadd [#allocation8], 4294967168 }
  0xe1   :  { %191 = vsyncpa [#allocation8], 1 }
  0xe2   :  { %192 = vsyncmov [#allocation3] }
  0xe5   :  { %s193_s15 = vpop.sfrf %192 }
  0xe6   :  { %p278_p11 = scmp.ne.s32.totalorder %s193_s15, 0 }
  0xe8   :  { %197 = shalt.err (%p278_p11)  }
  0xe9   :  { %199 = vsyncmov [#allocation3 + $0x1] }
  0xec   :  { %s200_s16 = vpop.sfrf %199 }
  0xed   :  { %p279_p12 = scmp.ne.s32.totalorder %s200_s16, 0 }
  0xef   :  { %204 = shalt.err (%p279_p12)  }
  0xf0   :  { %206 = vsyncmov [#allocation3 + $0x2] }
  0xf3   :  { %s207_s20 = vpop.sfrf %206 }
  0xf4   :  { %p280_p13 = scmp.ne.s32.totalorder %s207_s20, 0 }
  0xf6   :  { %211 = shalt.err (%p280_p13)  }
  0xf7   :  { %213 = vsyncmov [#allocation3 + $0x3] }
  0xfa   :  { %s214_s0 = vpop.sfrf %213 }
  0xfb   :  { %p281_p0 = scmp.ne.s32.totalorder %s214_s0, 0 }
  0xfd   :  { %218 = shalt.err (%p281_p0)  }
  0xfe   :  { %220 = vsyncmov [#allocation3 + $0x4] }
 0x101   :  { %s221_s3 = vpop.sfrf %220 }
 0x102   :  { %p282_p1 = scmp.ne.s32.totalorder %s221_s3, 0 }
 0x104   :  { %225 = shalt.err (%p282_p1)  }
 0x105   :  { %227 = vsyncmov [#allocation3 + $0x5] }
 0x108   :  { %s228_s22 = vpop.sfrf %227 }
 0x109   :  { %p283_p2 = scmp.ne.s32.totalorder %s228_s22, 0 }
 0x10b   :  { %232 = shalt.err (%p283_p2)  }
 0x10c   :  { %234 = vsyncmov [#allocation3 + $0x6] }
 0x10f   :  { %s235_s17 = vpop.sfrf %234 }
 0x110   :  { %p284_p3 = scmp.ne.s32.totalorder %s235_s17, 0 }
 0x112   :  { %239 = shalt.err (%p284_p3)  }
 0x113   :  { %241 = vsyncmov [#allocation3 + $0x7] }
 0x116   :  { %s242_s18 = vpop.sfrf %241 }
 0x117   :  { %p285_p4 = scmp.ne.s32.totalorder %s242_s18, 0 }
 0x119   :  { %246 = shalt.err (%p285_p4)  }

</bundles_post_ra>
